<compile_context>
chip_gen: v5e
topology: v5e:2x2
jax: 0.10.0
libtpu: 0.0.40
codegen_flags: <defaults>
</compile_context>

<pallas_src>
import jax
import jax.numpy as jnp
from jax import lax
from jax.experimental import pallas as pl
from jax.experimental.pallas import tpu as pltpu


def dqn_mlp_kernel(state_ref, act_ref, w1s_ref, w1ab_ref,
                   w2_ref, b2_ref, w3_ref, b3_ref, out_ref):
    """Fused Q(s,a): relu(s@W1s + onehot(a)@(W1a+b1)) -> relu(.@W2+b2) . w3 + b3."""
    x = state_ref[...]                           # (TB, in_dim)  f32
    act = act_ref[...]                           # (TB, 1)       int32
    tb = x.shape[0]
    n_actions = w1ab_ref.shape[0]

    # fc1: state part and the one-hot action "row gather" both on the MXU.
    oh = (act == lax.broadcasted_iota(jnp.int32, (tb, n_actions), 1)
          ).astype(jnp.float32)                  # (TB, n_actions)
    h1 = jnp.dot(x, w1s_ref[...], preferred_element_type=jnp.float32)
    h1 = h1 + jnp.dot(oh, w1ab_ref[...], preferred_element_type=jnp.float32)
    h1 = jnp.maximum(h1, 0.0)

    # fc2 on the MXU.
    h2 = jnp.dot(h1, w2_ref[...], preferred_element_type=jnp.float32) + b2_ref[...]
    h2 = jnp.maximum(h2, 0.0)

    # fc3 (fc2 -> 1): VPU multiply + XLU lane reduce (skip the N=1 matmul).
    q = jnp.sum(h2 * w3_ref[...], axis=-1, keepdims=True) + b3_ref[0, 0]
    out_ref[...] = q                             # (TB, 1)


def _pick_batch_tile(B):
    """Large tiles to amortize per-step overhead; >= 2 steps for big batches
    so the 'parallel' batch axis can shard across both v7x TensorCores."""
    if B <= 1024:
        return B                                 # single grid step
    half = -(-B // 2)
    half = -(-half // 8) * 8                     # round up to a multiple of 8
    return min(4096, half)


def deep_q_network_forward(state, action, packed_params):
    """state: (B, input_dims) f32, action: (B,) int32 -> Q: (B, 1) f32."""
    w1_state, w1_action_b, w2, b2, w3_row, b3 = packed_params
    B, in_dim = state.shape
    fc1 = w1_state.shape[1]
    fc2 = w2.shape[1]
    n_actions = w1_action_b.shape[0]

    act2d = action.reshape(B, 1).astype(jnp.int32)

    TB = _pick_batch_tile(B)
    grid = (pl.cdiv(B, TB),)

    def resident(shape):  # weight/bias block pinned at block (0, 0) -> DMA'd once
        return pl.BlockSpec(shape, lambda i: (0, 0))

    out = pl.pallas_call(
        dqn_mlp_kernel,
        out_shape=jax.ShapeDtypeStruct((B, 1), jnp.float32),
        grid=grid,
        in_specs=[
            pl.BlockSpec((TB, in_dim), lambda i: (i, 0)),        # state tile
            pl.BlockSpec((TB, 1), lambda i: (i, 0)),             # action tile
            resident((in_dim, fc1)),                             # W1_state
            resident((n_actions, fc1)),                          # W1_action + b1
            resident((fc1, fc2)),                                # W2
            resident((1, fc2)),                                  # b2
            resident((1, fc2)),                                  # w3 as a row
            pl.BlockSpec(memory_space=pltpu.MemorySpace.SMEM),   # b3 scalar
        ],
        out_specs=pl.BlockSpec((TB, 1), lambda i: (i, 0)),
        compiler_params=pltpu.CompilerParams(
            dimension_semantics=("parallel",)),                  # shard on v7x
    )(state, act2d, w1_state, w1_action_b, w2, b2, w3_row, b3)

    return out                                                   # (B, 1)


def init_params(key, input_dims, fc1_dims, fc2_dims, n_actions):
    """nn.Linear-style init (uniform +/- 1/sqrt(fan_in)); PyTorch layout."""
    def linear(k, fan_in, fan_out):
        kw, kb = jax.random.split(k)
        bound = 1.0 / jnp.sqrt(fan_in)
        w = jax.random.uniform(kw, (fan_in, fan_out), jnp.float32, -bound, bound)
        b = jax.random.uniform(kb, (1, fan_out), jnp.float32, -bound, bound)
        return w, b

    k1, k2, k3 = jax.random.split(key, 3)
    w1, b1 = linear(k1, input_dims + n_actions, fc1_dims)
    w2, b2 = linear(k2, fc1_dims, fc2_dims)
    w3, b3 = linear(k3, fc2_dims, 1)
    return (w1, b1, w2, b2, w3, b3)


def pack_params(params, input_dims):
    """One-time repack: split W1 into [state | action] rows, fold b1 into the
    action rows (exact: exactly one one-hot row added per sample), w3 -> row."""
    w1, b1, w2, b2, w3, b3 = params
    w1_state = w1[:input_dims]              # (input_dims, fc1)
    w1_action_b = w1[input_dims:] + b1      # (n_actions, fc1), b1 folded in
    w3_row = w3.T                           # (1, fc2)
    return (w1_state, w1_action_b, w2, b2, w3_row, b3)   # b3: (1, 1) -> SMEM


if __name__ == "__main__":
    batch = 8
    input_dims = 16
    fc1_dims = 32
    fc2_dims = 32
    n_actions = 4

    key = jax.random.PRNGKey(0)
    k_params, k_state, k_action = jax.random.split(key, 3)

    params = init_params(k_params, input_dims, fc1_dims, fc2_dims, n_actions)
    packed = pack_params(params, input_dims)

    state = jax.random.normal(k_state, (batch, input_dims), dtype=jnp.float32)
    action = jax.random.randint(k_action, (batch,), 0, n_actions, dtype=jnp.int32)

    q = deep_q_network_forward(state, action, packed)
    q = jax.block_until_ready(q)

    # Pure-JAX reference (identical math to the PyTorch module).
    w1, b1, w2, b2, w3, b3 = params
    sa = jnp.concatenate(
        [state, jax.nn.one_hot(action, n_actions, dtype=state.dtype)], axis=1)
    h1 = jnp.maximum(sa @ w1 + b1, 0.0)
    h2 = jnp.maximum(h1 @ w2 + b2, 0.0)
    q_ref = h2 @ w3 + b3

    assert q.shape == (batch, 1)
    assert jnp.allclose(q, q_ref, atol=1e-5, rtol=1e-5)
    print("KERNEL_OK")
</pallas_src>

<mosaic_0001>
module attributes {stable_mosaic.version = 11 : i64} {
  func.func @dqn_mlp_kernel(%arg0: i32, %arg1: memref<8x16xf32, #tpu.memory_space<vmem>>, %arg2: memref<8x1xi32, #tpu.memory_space<vmem>>, %arg3: memref<16x32xf32, #tpu.memory_space<vmem>>, %arg4: memref<4x32xf32, #tpu.memory_space<vmem>>, %arg5: memref<32x32xf32, #tpu.memory_space<vmem>>, %arg6: memref<1x32xf32, #tpu.memory_space<vmem>>, %arg7: memref<1x32xf32, #tpu.memory_space<vmem>>, %arg8: memref<1x1xf32, #tpu.memory_space<smem>>, %arg9: memref<8x1xf32, #tpu.memory_space<vmem>>) attributes {dimension_semantics = [#tpu.dimension_semantics<parallel>], iteration_bounds = array<i64: 1>, scalar_prefetch = 0 : i64, scratch_operands = 0 : i64, tpu.core_type = #tpu.core_type<tc>, window_params = [{transform_indices = @transform_0, window_bounds = array<i64: 8, 16>}, {transform_indices = @transform_1, window_bounds = array<i64: 8, 1>}, {pipeline_mode = #tpu.pipeline_mode<synchronous>, transform_indices = @transform_2, window_bounds = array<i64: 16, 32>}, {pipeline_mode = #tpu.pipeline_mode<synchronous>, transform_indices = @transform_3, window_bounds = array<i64: 4, 32>}, {pipeline_mode = #tpu.pipeline_mode<synchronous>, transform_indices = @transform_4, window_bounds = array<i64: 32, 32>}, {pipeline_mode = #tpu.pipeline_mode<synchronous>, transform_indices = @transform_5, window_bounds = array<i64: 1, 32>}, {pipeline_mode = #tpu.pipeline_mode<synchronous>, transform_indices = @transform_6, window_bounds = array<i64: 1, 32>}, {transform_indices = @transform_7, window_bounds = array<i64: 1, 1>}, {transform_indices = @transform_8, window_bounds = array<i64: 8, 1>}]} {
    %c0 = arith.constant 0 : index
    %c0_0 = arith.constant 0 : index
    %0 = vector.load %arg1[%c0, %c0_0] : memref<8x16xf32, #tpu.memory_space<vmem>>, vector<8x16xf32>
    %c0_1 = arith.constant 0 : index
    %c0_2 = arith.constant 0 : index
    %1 = vector.load %arg2[%c0_1, %c0_2] : memref<8x1xi32, #tpu.memory_space<vmem>>, vector<8x1xi32>
    %2 = tpu.iota {dimensions = array<i32: 1>} : vector<8x4xi32>
    %3 = vector.broadcast %1 : vector<8x1xi32> to vector<8x4xi32>
    %4 = arith.cmpi eq, %3, %2 : vector<8x4xi32>
    %5 = arith.extui %4 : vector<8x4xi1> to vector<8x4xi32>
    %6 = arith.sitofp %5 : vector<8x4xi32> to vector<8x4xf32>
    %c0_3 = arith.constant 0 : index
    %c0_4 = arith.constant 0 : index
    %7 = vector.load %arg3[%c0_3, %c0_4] : memref<16x32xf32, #tpu.memory_space<vmem>>, vector<16x32xf32>
    %cst = arith.constant dense<0.000000e+00> : vector<8x32xf32>
    %8 = tpu.matmul %0, %7, %cst {dimension_numbers = #tpu.dot_dimension_numbers<[1], [0], [0], [1], [0, 0, 1, 1], [], []>} : vector<8x16xf32>, vector<16x32xf32>, vector<8x32xf32> -> vector<8x32xf32>
    %c0_5 = arith.constant 0 : index
    %c0_6 = arith.constant 0 : index
    %9 = vector.load %arg4[%c0_5, %c0_6] : memref<4x32xf32, #tpu.memory_space<vmem>>, vector<4x32xf32>
    %cst_7 = arith.constant dense<0.000000e+00> : vector<8x32xf32>
    %10 = tpu.matmul %6, %9, %cst_7 {dimension_numbers = #tpu.dot_dimension_numbers<[1], [0], [0], [1], [0, 0, 1, 1], [], []>} : vector<8x4xf32>, vector<4x32xf32>, vector<8x32xf32> -> vector<8x32xf32>
    %11 = arith.addf %8, %10 : vector<8x32xf32>
    %cst_8 = arith.constant 0.000000e+00 : f32
    %12 = vector.broadcast %cst_8 : f32 to vector<8x32xf32>
    %13 = arith.maximumf %11, %12 : vector<8x32xf32>
    %c0_9 = arith.constant 0 : index
    %c0_10 = arith.constant 0 : index
    %14 = vector.load %arg5[%c0_9, %c0_10] : memref<32x32xf32, #tpu.memory_space<vmem>>, vector<32x32xf32>
    %cst_11 = arith.constant dense<0.000000e+00> : vector<8x32xf32>
    %15 = tpu.matmul %13, %14, %cst_11 {dimension_numbers = #tpu.dot_dimension_numbers<[1], [0], [0], [1], [0, 0, 1, 1], [], []>} : vector<8x32xf32>, vector<32x32xf32>, vector<8x32xf32> -> vector<8x32xf32>
    %c0_12 = arith.constant 0 : index
    %c0_13 = arith.constant 0 : index
    %16 = vector.load %arg6[%c0_12, %c0_13] : memref<1x32xf32, #tpu.memory_space<vmem>>, vector<1x32xf32>
    %17 = vector.broadcast %16 : vector<1x32xf32> to vector<8x32xf32>
    %18 = arith.addf %15, %17 : vector<8x32xf32>
    %cst_14 = arith.constant 0.000000e+00 : f32
    %19 = vector.broadcast %cst_14 : f32 to vector<8x32xf32>
    %20 = arith.maximumf %18, %19 : vector<8x32xf32>
    %c0_15 = arith.constant 0 : index
    %c0_16 = arith.constant 0 : index
    %21 = vector.load %arg7[%c0_15, %c0_16] : memref<1x32xf32, #tpu.memory_space<vmem>>, vector<1x32xf32>
    %22 = vector.broadcast %21 : vector<1x32xf32> to vector<8x32xf32>
    %23 = arith.mulf %20, %22 : vector<8x32xf32>
    %cst_17 = arith.constant dense<0.000000e+00> : vector<8xf32>
    %24 = vector.multi_reduction <add>, %23, %cst_17 [1] : vector<8x32xf32> to vector<8xf32>
    %25 = vector.shape_cast %24 : vector<8xf32> to vector<8x1xf32>
    %c0_18 = arith.constant 0 : index
    %c0_19 = arith.constant 0 : index
    %26 = memref.load %arg8[%c0_18, %c0_19] : memref<1x1xf32, #tpu.memory_space<smem>>
    %27 = vector.broadcast %26 : f32 to vector<8x1xf32>
    %28 = arith.addf %25, %27 : vector<8x1xf32>
    %c0_20 = arith.constant 0 : index
    %c0_21 = arith.constant 0 : index
    %29 = vector.load %arg9[%c0_20, %c0_21] : memref<8x1xf32, #tpu.memory_space<vmem>>, vector<8x1xf32>
    tpu.vector_store %arg9[%c0_20, %c0_21], %28 {strides = array<i32>} : memref<8x1xf32, #tpu.memory_space<vmem>>, vector<8x1xf32>,
    return
  }
  func.func @transform_0(%arg0: i32) -> (i32, i32) {
    %c0_i32 = arith.constant 0 : i32
    %c0_i32_0 = arith.constant 0 : i32
    return %arg0, %c0_i32 : i32, i32
  }
  func.func @transform_1(%arg0: i32) -> (i32, i32) {
    %c0_i32 = arith.constant 0 : i32
    %c0_i32_0 = arith.constant 0 : i32
    return %arg0, %c0_i32 : i32, i32
  }
  func.func @transform_2(%arg0: i32) -> (i32, i32) {
    %c0_i32 = arith.constant 0 : i32
    %c0_i32_0 = arith.constant 0 : i32
    %c0_i32_1 = arith.constant 0 : i32
    return %c0_i32, %c0_i32_0 : i32, i32
  }
  func.func @transform_3(%arg0: i32) -> (i32, i32) {
    %c0_i32 = arith.constant 0 : i32
    %c0_i32_0 = arith.constant 0 : i32
    %c0_i32_1 = arith.constant 0 : i32
    return %c0_i32, %c0_i32_0 : i32, i32
  }
  func.func @transform_4(%arg0: i32) -> (i32, i32) {
    %c0_i32 = arith.constant 0 : i32
    %c0_i32_0 = arith.constant 0 : i32
    %c0_i32_1 = arith.constant 0 : i32
    return %c0_i32, %c0_i32_0 : i32, i32
  }
  func.func @transform_5(%arg0: i32) -> (i32, i32) {
    %c0_i32 = arith.constant 0 : i32
    %c0_i32_0 = arith.constant 0 : i32
    %c0_i32_1 = arith.constant 0 : i32
    return %c0_i32, %c0_i32_0 : i32, i32
  }
  func.func @transform_6(%arg0: i32) -> (i32, i32) {
    %c0_i32 = arith.constant 0 : i32
    %c0_i32_0 = arith.constant 0 : i32
    %c0_i32_1 = arith.constant 0 : i32
    return %c0_i32, %c0_i32_0 : i32, i32
  }
  func.func @transform_7(%arg0: i32) -> (i32, i32) {
    %c0_i32 = arith.constant 0 : i32
    %c0_i32_0 = arith.constant 0 : i32
    %c0_i32_1 = arith.constant 0 : i32
    return %c0_i32, %c0_i32_0 : i32, i32
  }
  func.func @transform_8(%arg0: i32) -> (i32, i32) {
    %c0_i32 = arith.constant 0 : i32
    %c0_i32_0 = arith.constant 0 : i32
    return %arg0, %c0_i32 : i32, i32
  }
}

</mosaic_0001>

<bundles_post_ra>
// kernel: tpu_custom_call.1
= control target key start
LH: loop header
LB: loop body
LE: loop exit
PB: predicated region body
PF: predicated region fallthrough
CT: control target
= control target key end

     0   :  { %14 = vsyncpa [#allocation4], 0  ;;  %s363_s0 = inlined_call_operand.vmem [shape: f32[8,16], index: 0, kind: input, shape index: {}]   ;;  %s364_s1 = inlined_call_operand.vmem [shape: s32[8,1], index: 1, kind: input, shape index: {}]   ;;  %s365_s2 = inlined_call_operand.hbm [shape: f32[16,32], index: 2, kind: input, shape index: {}]   ;;  %s366_s3 = inlined_call_operand.hbm [shape: f32[4,32], index: 3, kind: input, shape index: {}]   ;;  %s367_s4 = inlined_call_operand.hbm [shape: f32[32,32], index: 4, kind: input, shape index: {}]   ;;  %s368_s5 = inlined_call_operand.vmem [shape: f32[1,32], index: 5, kind: input, shape index: {}]   ;;  %s369_s6 = inlined_call_operand.vmem [shape: f32[1,32], index: 6, kind: input, shape index: {}]   ;;  %s370_s7 = inlined_call_operand.<no memory space> [shape: f32[1,1], index: 7, kind: input, shape index: {}]   ;;  %s371_s8 = inlined_call_operand.vmem [shape: f32[8,1], index: 8, kind: output, shape index: {}]  }
   0x1   :  { %15 = vsyncpa [#allocation6], 0  ;;  %s38_s29 = sshll.u32 %s366_s3, 4  ;;  %s284_s30 = smov [#allocation5]   ;;  %s39_s29 = int_to_ptr.hbm [resolvable:$true] %s38_s29 }
   0x2   :  { %s40_s9 = sshll.u32 %s284_s30, 4  ;;  %s24_s12 = sshll.u32 %s365_s2, 4  ;;  %s41_s9 = int_to_ptr.vmem [resolvable:$true] %s40_s9  ;;  %s25_s12 = int_to_ptr.hbm [resolvable:$true] %s24_s12 }
   0x3   :  { %43 = dma.hbm_to_vmem [thread:$0]  %s39_s29, 64, %s41_s9, [#allocation6]  }
   0x4   :  { %s285_s13 = smov [#allocation3]   ;;  %s286_s15 = smov 128  }
   0x5   :  { %s26_s14 = sshll.u32 %s285_s13, 4  ;;  %s287_s16 = smov 8   ;;  %s27_s14 = int_to_ptr.vmem [resolvable:$true] %s26_s14 }
   0x6   :  { %32 = dma.hbm_to_vmem [thread:$0]  %s25_s12, 256, %s27_s14, [#allocation4], %s286_s15, %s286_s15, %s287_s16  }
   0x7   :  { %s48_s3 = sshll.u32 %s367_s4, 4  ;;  %s288_s19 = smov [#allocation7]   ;;  %s49_s3 = int_to_ptr.hbm [resolvable:$true] %s48_s3 }
   0x8   :  { %s50_s20 = sshll.u32 %s288_s19, 4  ;;  %s51_s20 = int_to_ptr.vmem [resolvable:$true] %s50_s20 }
   0x9   :  { %56 = dma.hbm_to_vmem [thread:$0]  %s49_s3, 512, %s51_s20, [#allocation6], %s286_s15, %s286_s15, %s287_s16  }
   0xa   :  { %280 = dma.done.wait [#allocation4], 256  }
   0xb   :  { %281 = vsyncadd [#allocation4], 4294967040 }
   0xc   :  { %282 = dma.done.wait [#allocation6], 576  }
   0xd   :  { %283 = vsyncadd [#allocation6], 4294966720  ;;  %v289_v0 = vmov 0   ;;  %v76_v1 = vld [vmem:[%s364_s1] sm:$0xff]  ;;  %v86_v2 = vld [vmem:[#allocation3 + $0x8] sm:$0xff]  ;;  %vm92_vm0 = vcmask 1043456   ;;  %v77_v7 = vlaneseq  ;;  %v183_v26 = vstv %s370_s7 }
   0xe   :  { %205 = vset.pattern.permute.xlu0 %v289_v0  ;;  %134 = vmatpush.msra.mxu1 %v86_v2  ;;  %v87_v3 = vld [vmem:[#allocation5] sm:$0xf]  ;;  %v85_v4 = vld [vmem:[#allocation3] sm:$0xff]  ;;  %vm116_vm1 = vcmask 130048   ;;  %vm88_vm2 = vcmask 31744   ;;  %v290_v10 = vmov 0.0  }
   0xf   :  { %80 = vperm.xlu0 %205, %v76_v1   ;;  %194 = vmatpush.msk.msra.mxu0 %vm92_vm0, %v87_v3  ;;  %v75_v5 = vld [vmem:[%s363_s0] sm:$0xff]  ;;  %v144_v6 = vld [vmem:[#allocation7 + $0x18] sm:$0xff]  ;;  %v78_v8 = vand.u32 127, %v77_v7  ;;  %v141_v14 = vld [vmem:[#allocation7] sm:$0xff]  ;;  %vm149_vm4 = vcmask 261120   ;;  %vm185_vm5 = vcmask 7168  }
  0x10   :  { %135 = vmatpush.msra.mxu1 %v85_v4  ;;  %165 = vmatpush.msra.mxu2 %v144_v6  ;;  %v143_v12 = vld [vmem:[#allocation7 + $0x10] sm:$0xff]  ;;  %v142_v13 = vld [vmem:[#allocation7 + $0x8] sm:$0xff] }
  0x11   :  { %196 = vmatmul.msk.f32.vlgmr.msra.gmra.mxu1 %vm116_vm1, %v75_v5  ;;  %v206_v19 = vld [vmem:[%s368_s5] ss:$0 sm:$0xff] }
  0x12   :  { %166 = vmatpush.msra.mxu2 %v143_v12  ;;  %v207_v22 = vld [vmem:[%s369_s6] ss:$0 sm:$0xff] }
  0x14   :  { %167 = vmatpush.msra.mxu2 %v142_v13 }
  0x16   :  { %168 = vmatpush.msra.mxu2 %v141_v14 }
  0x81   :  { %v81_v9 = vpop.permute.xlu0 %80 }
  0x82   :  { %vm82_vm3 = vcmp.eq.s32.totalorder %v81_v9, %v78_v8 }
  0x83   :  { %v193_v11 = vsel %vm82_vm3, 1.0, %v290_v10 }
  0x84   :  { %195 = vmatmul.msk.f32.vlgmr.msra.gmra.mxu0 %vm88_vm2, %v193_v11 }
  0x8e   :  { %v137_v15 = vpop.f32.mrf.mxu1 }
 0x101   :  { %v113_v16 = vpop.f32.mrf.mxu0 }
 0x102   :  { %v138_v17 = vadd.f32 %v137_v15, %v113_v16 }
 0x104   :  { %v140_v18 = vmax.f32 %v138_v17, 0.0 }
 0x106   :  { %197 = vmatmul.msk.f32.vlgmr.msra.gmra.mxu2 %vm149_vm4, %v140_v18 }
 0x189   :  { %v170_v20 = vpop.f32.mrf.mxu2 }
 0x18a   :  { %v171_v21 = vadd.f32 %v206_v19, %v170_v20 }
 0x18c   :  { %v173_v23 = vmax.f32 %v171_v21, 0.0 }
 0x18e   :  { %v178_v24 = vmul.f32 %v207_v22, %v173_v23 }
 0x190   :  { %v179_v25 = vsel %vm149_vm4, %v178_v24, 0.0 }
 0x191   :  { %180 = vadd.xlane.f32.xlu0 %v179_v25 }
 0x204   :  { %v181_v27 = vpop.xlane.xlu0 %180 }
 0x205   :  { %v184_v28 = vadd.f32 %v183_v26, %v181_v27 }
 0x207   :  { %186 = vst.msk [vmem:[%s371_s8] sm:$0xff] %vm185_vm5, %v184_v28 }
 0x208   :  { %191 = vsyncpa [#allocation4], 1 }
 0x209   :  { %192 = vsyncpa [#allocation6], 1 }

</bundles_post_ra>
